<compile_context>
chip_gen: v7x
topology: tpu7x:2x2x1
jax: 0.10.0
libtpu: 0.0.40
codegen_flags: <defaults>
</compile_context>

<pallas_src>
import functools

import jax
import jax.numpy as jnp
from jax import lax
from jax.experimental import pallas as pl
from jax.experimental.pallas import tpu as pltpu


def _leaky(h, leaky_param):
    if 0.0 < leaky_param < 1.0:
        return jnp.maximum(h, leaky_param * h)      # single vmax per vreg
    return jnp.where(h >= 0, h, leaky_param * h)    # general fallback


def _res_block_kernel(x_ref, w1_ref, b1_ref, w2_ref, b2_ref, o_ref, *,
                      dilation, leaky_param, res_scale, seq_len):
    # x_ref : (C_in, bt*L)         lane-packed activations (also residual)
    # w1_ref: (C_state, 3*C_in)    conv1 taps folded:  [tap0 | tap1 | tap2]
    # b1_ref: (C_state, 1)
    # w2_ref: (C_in, C_state)      1x1 conv
    # b2_ref: (C_in, 1)
    # o_ref : (C_in, bt*L)
    d = dilation
    L = seq_len
    C_in, N = x_ref.shape  # N = bt * L

    x = x_ref[...]

    # Within-batch lane position: the block start is a multiple of L, so a
    # block-local iota mod L gives the position inside each batch element.
    pos = lax.broadcasted_iota(jnp.int32, (C_in, N), 1) % L
    mask_m = pos >= d          # valid lanes for tap x[t - d]
    mask_p = pos < (L - d)     # valid lanes for tap x[t + d]

    # Shifted taps built on-chip (XLU roll + VPU mask), once for the whole
    # lane-packed slab.  The mask both applies conv zero-padding and zeroes
    # lanes where the roll wrapped across a batch boundary.
    x_m = jnp.where(mask_m, pltpu.roll(x, shift=d % N, axis=1), 0)
    x_p = jnp.where(mask_p, pltpu.roll(x, shift=(N - d) % N, axis=1), 0)
    stacked = jnp.concatenate([x_m, x, x_p], axis=0)          # (3*C_in, N)

    # conv1 (kernel 3, dilation d, padding d): one wide MXU matmul.
    h = jnp.dot(w1_ref[...], stacked, preferred_element_type=jnp.float32)
    h = _leaky(h + b1_ref[...], leaky_param)

    # conv2 (1x1): second wide MXU matmul.
    h2 = jnp.dot(w2_ref[...], h, preferred_element_type=jnp.float32)
    h2 = _leaky(h2 + b2_ref[...], leaky_param)

    # Residual add in f32; single lane-dense full-tile store.
    o_ref[...] = (x.astype(jnp.float32) + res_scale * h2).astype(o_ref.dtype)


def _choose_bt(B, L, bytes_per_batch):
    """Batch elements packed into one lane-tile: divides B, keeps lane width a
    multiple of 128, bounded by a 1 MiB block budget, grid kept >= 2 steps."""
    budget = 1 << 20
    bt = max(1, min(B, budget // max(1, bytes_per_batch)))
    if B >= 2:
        bt = max(1, min(bt, B // 2))   # keep >= 2 grid steps for megacore
    while bt > 1 and (B % bt != 0 or (bt * L) % 128 != 0):
        bt -= 1
    if bt == 1 and B > 1 and (L % 128 != 0):
        bt = B                          # fall back to one full-extent block
    return bt


def res_conv1d_block(x, w1, b1, w2, b2, *, dilation=1, leaky_param=0.2,
                     res_scale=1.0):
    """x: (B, C_in, L); w1: (C_state, C_in, 3); b1: (C_state,);
       w2: (C_in, C_state); b2: (C_in,)."""
    B, C_in, L = x.shape
    C_state = w1.shape[0]
    d = int(dilation)

    # Fold the 3 conv1 taps into one (C_state, 3*C_in) matrix; column block k
    # multiplies the tap-k shifted activation.
    w1_flat = jnp.transpose(w1, (0, 2, 1)).reshape(C_state, 3 * C_in)
    b1_2d = b1.reshape(C_state, 1).astype(jnp.float32)
    b2_2d = b2.reshape(C_in, 1).astype(jnp.float32)

    # Lane-pack the batch: (B, C_in, L) -> (C_in, B*L).  Pure layout plumbing
    # in the wrapper so the kernel sees one wide, lane-dense slab.
    x_packed = jnp.transpose(x, (1, 0, 2)).reshape(C_in, B * L)

    bt = _choose_bt(B, L, C_in * L * x.dtype.itemsize)
    n_tile = bt * L
    grid = ((B * L) // n_tile,)

    kernel = functools.partial(
        _res_block_kernel, dilation=d, leaky_param=float(leaky_param),
        res_scale=float(res_scale), seq_len=L)

    out_packed = pl.pallas_call(
        kernel,
        out_shape=jax.ShapeDtypeStruct((C_in, B * L), x.dtype),
        grid_spec=pltpu.PrefetchScalarGridSpec(
            num_scalar_prefetch=0,
            grid=grid,
            in_specs=[
                pl.BlockSpec((C_in, n_tile), lambda i: (0, i)),
                pl.BlockSpec((C_state, 3 * C_in), lambda i: (0, 0)),
                pl.BlockSpec((C_state, 1), lambda i: (0, 0)),
                pl.BlockSpec((C_in, C_state), lambda i: (0, 0)),
                pl.BlockSpec((C_in, 1), lambda i: (0, 0)),
            ],
            out_specs=pl.BlockSpec((C_in, n_tile), lambda i: (0, i)),
        ),
        compiler_params=pltpu.CompilerParams(
            dimension_semantics=("parallel",),
            vmem_limit_bytes=32 * 1024 * 1024),
    )(x_packed, w1_flat, b1_2d, w2, b2_2d)

    return jnp.transpose(out_packed.reshape(C_in, B, L), (1, 0, 2))


def _reference(x, w1, b1, w2, b2, *, dilation, leaky_param, res_scale):
    """Pure-JAX reference matching PyTorch Conv1d semantics (norm_type='none')."""
    d = dilation
    dn = lax.conv_dimension_numbers(x.shape, w1.shape, ('NCH', 'OIH', 'NCH'))
    h = lax.conv_general_dilated(x, w1, window_strides=(1,),
                                 padding=[(d, d)], rhs_dilation=(d,),
                                 dimension_numbers=dn)
    h = h + b1[None, :, None]
    h = jnp.where(h >= 0, h, leaky_param * h)
    h = jnp.einsum('oc,bcl->bol', w2, h) + b2[None, :, None]
    h = jnp.where(h >= 0, h, leaky_param * h)
    return x + res_scale * h


if __name__ == "__main__":
    # Small shapes consistent with the module: n_in=8, n_state=16, B=2, L=128.
    B, n_in, n_state, L = 2, 8, 16, 128
    leaky_param = 0.2
    res_scale = float(1.0 / jnp.sqrt(2.0))

    key = jax.random.PRNGKey(0)
    kx, k1, kb1, k2, kb2 = jax.random.split(key, 5)

    x = jax.random.normal(kx, (B, n_in, L), dtype=jnp.float32)
    # Deterministic parameter init (synthetic; shapes from Conv1d constructors).
    w1 = jax.random.normal(k1, (n_state, n_in, 3), dtype=jnp.float32) * 0.1
    b1 = jax.random.normal(kb1, (n_state,), dtype=jnp.float32) * 0.1
    w2 = jax.random.normal(k2, (n_in, n_state), dtype=jnp.float32) * 0.1
    b2 = jax.random.normal(kb2, (n_in,), dtype=jnp.float32) * 0.1

    for dilation in (1, 3):
        out = res_conv1d_block(x, w1, b1, w2, b2, dilation=dilation,
                               leaky_param=leaky_param, res_scale=res_scale)
        out = jax.block_until_ready(out)

        ref = _reference(x, w1, b1, w2, b2, dilation=dilation,
                         leaky_param=leaky_param, res_scale=res_scale)
        assert out.shape == (B, n_in, L)
        assert jnp.allclose(out, ref, rtol=1e-4, atol=1e-5), \
            f"mismatch vs reference (dilation={dilation})"

    print("KERNEL_OK")
</pallas_src>

<mosaic_0001>
module attributes {stable_mosaic.version = 11 : i64} {
  func.func @_res_block_kernel(%arg0: i32, %arg1: memref<8x128xf32, #tpu.memory_space<vmem>>, %arg2: memref<16x24xf32, #tpu.memory_space<vmem>>, %arg3: memref<16x1xf32, #tpu.memory_space<vmem>>, %arg4: memref<8x16xf32, #tpu.memory_space<vmem>>, %arg5: memref<8x1xf32, #tpu.memory_space<vmem>>, %arg6: memref<8x128xf32, #tpu.memory_space<vmem>>) attributes {dimension_semantics = [#tpu.dimension_semantics<parallel>], iteration_bounds = array<i64: 2>, scalar_prefetch = 0 : i64, scratch_operands = 0 : i64, tpu.core_type = #tpu.core_type<tc>, window_params = [{transform_indices = @transform_0, window_bounds = array<i64: 8, 128>}, {pipeline_mode = #tpu.pipeline_mode<synchronous>, transform_indices = @transform_1, window_bounds = array<i64: 16, 24>}, {pipeline_mode = #tpu.pipeline_mode<synchronous>, transform_indices = @transform_2, window_bounds = array<i64: 16, 1>}, {pipeline_mode = #tpu.pipeline_mode<synchronous>, transform_indices = @transform_3, window_bounds = array<i64: 8, 16>}, {pipeline_mode = #tpu.pipeline_mode<synchronous>, transform_indices = @transform_4, window_bounds = array<i64: 8, 1>}, {transform_indices = @transform_5, window_bounds = array<i64: 8, 128>}]} {
    %c0 = arith.constant 0 : index
    %c0_0 = arith.constant 0 : index
    %0 = vector.load %arg1[%c0, %c0_0] : memref<8x128xf32, #tpu.memory_space<vmem>>, vector<8x128xf32>
    %1 = tpu.iota {dimensions = array<i32: 1>} : vector<8x128xi32>
    %c128_i32 = arith.constant 128 : i32
    %c0_i32 = arith.constant 0 : i32
    %2 = arith.cmpi eq, %c128_i32, %c0_i32 : i32
    %c1_i32 = arith.constant 1 : i32
    %3 = arith.select %2, %c1_i32, %c128_i32 : i32
    %4 = vector.broadcast %3 : i32 to vector<8x128xi32>
    %5 = arith.remsi %1, %4 : vector<8x128xi32>
    %c0_i32_1 = arith.constant 0 : i32
    %6 = vector.broadcast %c0_i32_1 : i32 to vector<8x128xi32>
    %7 = arith.cmpi ne, %5, %6 : vector<8x128xi32>
    %c0_i32_2 = arith.constant 0 : i32
    %8 = vector.broadcast %c0_i32_2 : i32 to vector<8x128xi32>
    %9 = arith.cmpi slt, %5, %8 : vector<8x128xi32>
    %c0_i32_3 = arith.constant 0 : i32
    %10 = arith.cmpi slt, %3, %c0_i32_3 : i32
    %11 = vector.broadcast %10 : i1 to vector<8x128xi1>
    %12 = vector.broadcast %11 : vector<8x128xi1> to vector<8x128xi1>
    %13 = arith.xori %9, %12 : vector<8x128xi1>
    %14 = arith.andi %13, %7 : vector<8x128xi1>
    %15 = vector.broadcast %3 : i32 to vector<8x128xi32>
    %16 = arith.addi %5, %15 : vector<8x128xi32>
    %17 = arith.select %14, %16, %5 : vector<8x128xi1>, vector<8x128xi32>
    %c1_i32_4 = arith.constant 1 : i32
    %18 = vector.broadcast %c1_i32_4 : i32 to vector<8x128xi32>
    %19 = arith.cmpi sge, %17, %18 : vector<8x128xi32>
    %c127_i32 = arith.constant 127 : i32
    %20 = vector.broadcast %c127_i32 : i32 to vector<8x128xi32>
    %21 = arith.cmpi slt, %17, %20 : vector<8x128xi32>
    %c1_i32_5 = arith.constant 1 : i32
    %22 = tpu.dynamic_rotate %0 by %c1_i32_5 dim 1 : vector<8x128xf32>, i32 -> vector<8x128xf32>
    %c0_i32_6 = arith.constant 0 : i32
    %23 = arith.sitofp %c0_i32_6 : i32 to f32
    %24 = vector.broadcast %23 : f32 to vector<8x128xf32>
    %25 = arith.select %19, %22, %24 : vector<8x128xi1>, vector<8x128xf32>
    %c127_i32_7 = arith.constant 127 : i32
    %26 = tpu.dynamic_rotate %0 by %c127_i32_7 dim 1 : vector<8x128xf32>, i32 -> vector<8x128xf32>
    %c0_i32_8 = arith.constant 0 : i32
    %27 = arith.sitofp %c0_i32_8 : i32 to f32
    %28 = vector.broadcast %27 : f32 to vector<8x128xf32>
    %29 = arith.select %21, %26, %28 : vector<8x128xi1>, vector<8x128xf32>
    %30 = tpu.concatenate %25, %0, %29 in 0 : vector<8x128xf32>, vector<8x128xf32>, vector<8x128xf32> -> vector<24x128xf32>
    %c0_9 = arith.constant 0 : index
    %c0_10 = arith.constant 0 : index
    %31 = vector.load %arg2[%c0_9, %c0_10] : memref<16x24xf32, #tpu.memory_space<vmem>>, vector<16x24xf32>
    %cst = arith.constant dense<0.000000e+00> : vector<16x128xf32>
    %32 = tpu.matmul %31, %30, %cst {dimension_numbers = #tpu.dot_dimension_numbers<[1], [0], [0], [1], [0, 0, 1, 1], [], []>} : vector<16x24xf32>, vector<24x128xf32>, vector<16x128xf32> -> vector<16x128xf32>
    %c0_11 = arith.constant 0 : index
    %c0_12 = arith.constant 0 : index
    %33 = vector.load %arg3[%c0_11, %c0_12] : memref<16x1xf32, #tpu.memory_space<vmem>>, vector<16x1xf32>
    %34 = vector.broadcast %33 : vector<16x1xf32> to vector<16x128xf32>
    %35 = arith.addf %32, %34 : vector<16x128xf32>
    %cst_13 = arith.constant 2.000000e-01 : f32
    %36 = vector.broadcast %cst_13 : f32 to vector<16x128xf32>
    %37 = arith.mulf %36, %35 : vector<16x128xf32>
    %38 = arith.maximumf %35, %37 : vector<16x128xf32>
    %c0_14 = arith.constant 0 : index
    %c0_15 = arith.constant 0 : index
    %39 = vector.load %arg4[%c0_14, %c0_15] : memref<8x16xf32, #tpu.memory_space<vmem>>, vector<8x16xf32>
    %cst_16 = arith.constant dense<0.000000e+00> : vector<8x128xf32>
    %40 = tpu.matmul %39, %38, %cst_16 {dimension_numbers = #tpu.dot_dimension_numbers<[1], [0], [0], [1], [0, 0, 1, 1], [], []>} : vector<8x16xf32>, vector<16x128xf32>, vector<8x128xf32> -> vector<8x128xf32>
    %c0_17 = arith.constant 0 : index
    %c0_18 = arith.constant 0 : index
    %41 = vector.load %arg5[%c0_17, %c0_18] : memref<8x1xf32, #tpu.memory_space<vmem>>, vector<8x1xf32>
    %42 = vector.broadcast %41 : vector<8x1xf32> to vector<8x128xf32>
    %43 = arith.addf %40, %42 : vector<8x128xf32>
    %cst_19 = arith.constant 2.000000e-01 : f32
    %44 = vector.broadcast %cst_19 : f32 to vector<8x128xf32>
    %45 = arith.mulf %44, %43 : vector<8x128xf32>
    %46 = arith.maximumf %43, %45 : vector<8x128xf32>
    %cst_20 = arith.constant 0.707106769 : f32
    %47 = vector.broadcast %cst_20 : f32 to vector<8x128xf32>
    %48 = arith.mulf %47, %46 : vector<8x128xf32>
    %49 = arith.addf %0, %48 : vector<8x128xf32>
    %c0_21 = arith.constant 0 : index
    %c0_22 = arith.constant 0 : index
    %50 = vector.load %arg6[%c0_21, %c0_22] : memref<8x128xf32, #tpu.memory_space<vmem>>, vector<8x128xf32>
    tpu.vector_store %arg6[%c0_21, %c0_22], %49 {strides = array<i32>} : memref<8x128xf32, #tpu.memory_space<vmem>>, vector<8x128xf32>,
    return
  }
  func.func @transform_0(%arg0: i32) -> (i32, i32) {
    %c0_i32 = arith.constant 0 : i32
    %c0_i32_0 = arith.constant 0 : i32
    return %c0_i32, %arg0 : i32, i32
  }
  func.func @transform_1(%arg0: i32) -> (i32, i32) {
    %c0_i32 = arith.constant 0 : i32
    %c0_i32_0 = arith.constant 0 : i32
    %c0_i32_1 = arith.constant 0 : i32
    return %c0_i32, %c0_i32_0 : i32, i32
  }
  func.func @transform_2(%arg0: i32) -> (i32, i32) {
    %c0_i32 = arith.constant 0 : i32
    %c0_i32_0 = arith.constant 0 : i32
    %c0_i32_1 = arith.constant 0 : i32
    return %c0_i32, %c0_i32_0 : i32, i32
  }
  func.func @transform_3(%arg0: i32) -> (i32, i32) {
    %c0_i32 = arith.constant 0 : i32
    %c0_i32_0 = arith.constant 0 : i32
    %c0_i32_1 = arith.constant 0 : i32
    return %c0_i32, %c0_i32_0 : i32, i32
  }
  func.func @transform_4(%arg0: i32) -> (i32, i32) {
    %c0_i32 = arith.constant 0 : i32
    %c0_i32_0 = arith.constant 0 : i32
    %c0_i32_1 = arith.constant 0 : i32
    return %c0_i32, %c0_i32_0 : i32, i32
  }
  func.func @transform_5(%arg0: i32) -> (i32, i32) {
    %c0_i32 = arith.constant 0 : i32
    %c0_i32_0 = arith.constant 0 : i32
    return %c0_i32, %arg0 : i32, i32
  }
}

</mosaic_0001>

<bundles_post_ra>
// kernel: tpu_custom_call.1
= control target key start
LH: loop header
LB: loop body
LE: loop exit
PB: predicated region body
PF: predicated region fallthrough
CT: control target
= control target key end

     0   :  { %10 = vsyncpa [#allocation3], 0  ;;  %s926_s0 = inlined_call_operand.vmem [shape: f32[8,256], index: 0, kind: input, shape index: {}]   ;;  %s927_s1 = inlined_call_operand.hbm [shape: f32[16,24], index: 1, kind: input, shape index: {}]   ;;  %s928_s2 = inlined_call_operand.vmem [shape: f32[16,1], index: 2, kind: input, shape index: {}]   ;;  %s929_s3 = inlined_call_operand.vmem [shape: f32[8,16], index: 3, kind: input, shape index: {}]   ;;  %s930_s4 = inlined_call_operand.vmem [shape: f32[8,1], index: 4, kind: input, shape index: {}]   ;;  %s931_s5 = inlined_call_operand.hbm [shape: f32[8,256], index: 5, kind: output, shape index: {}]  }
   0x1   :  { %11 = vsyncpa [#allocation4], 0 }
   0x2   :  { %13 = vsyncpa [#allocation4 + $0x1], 0  ;;  %s777_s18 = smov 0   ;;  %s779_s19 = smov 0  }
   0x3   :  { %s781_s20 = smov 0   ;;  %s783_s21 = smov 0  }
   0x4 LB: > { %s798_s22 = sadd.s32 4294967295, %s734_s21   ;;  %s529_s23 = sadd.s32 4294967294, %s734_s21   ;;  %s734_s21 = sphi %s783_s21, %s947_s21   ;;  %s730_s20 = sphi %s781_s20, %s946_s20   ;;  %s726_s19 = sphi %s779_s19, %s945_s19   ;;  %s722_s18 = sphi %s777_s18, %s944_s18  }
   0x5   : > { %s802_s24 = sadd.s32 1, %s734_s21   ;;  %s136_s25 = sadd.s32 1, %s730_s20 }
   0x6   : > { %s133_s26 = ssub.s32 %s734_s21, %s802_s24  ;;  %p146_p0 = scmp.ne.s32.totalorder %s730_s20, %s726_s19 }
   0x7   : > { %p134_p1 = scmp.eq.s32.totalorder %s133_s26, 0  ;;  %p147_p2 = scmp.eq.s32.totalorder %s798_s22, 1 }
   0x8   : > { %p152_p3 = scmp.ne.s32.totalorder %s726_s19, %s722_s18  ;;  %p153_p4 = scmp.eq.s32.totalorder %s529_s23, 1 }
   0x9   : > { %s813_s27 = scalar_select %p134_p1, %s730_s20, %s136_s25  }
   0xa   : > { %p815_p5 = por %p147_p2, %p146_p0  ;;  %p819_p6 = por %p153_p4, %p152_p3 }
   0xb   : > { %p530_p7 = scmp.ge.s32.totalorder %s734_s21, 1  ;;  %p160_p8 = scmp.lt.s32.totalorder %s734_s21, 3 }
   0xc   : > { %s935_s28 = scalar_select %p815_p5, 1, 0 }
   0xd   : > { %s936_s29 = scalar_select %p819_p6, 1, 0 }
   0xe   : > { %p932_p9 = scmp.eq.s32.totalorder %s798_s22, 0  ;;  %p826_p10 = pnand %p530_p7, %p160_p8 }
   0xf   : > { %s736_s6 = smov [#allocation2]   ;;  %s640_s11 = scalar_lea.hbm %s927_s1, 256 }
  0x10   : > { %s937_s30 = scalar_select %p826_p10, 1, 0 }
  0x11   : > { %s172_s7 = sshll.u32 %s736_s6, 4  ;;  %p585_p11 = pneg %p826_p10  ;;  %s173_s7 = int_to_ptr.vmem [resolvable:$true] %s172_s7 }
  0x12   : > { %p641_p13 = scmp.ne.s32.totalorder %s927_s1, %s640_s11  ;;  %p647_p3 = scmp.lt.u32.totalorder %s640_s11, %s927_s1 }
  0x13   : > { %p834_p12 = pnand %p932_p9, %p585_p11 }
  0x15   : > { %p642_p0 = pneg %p834_p12 }
  0x17   : > { %p643_p1 = pnand %p642_p0, %p641_p13 }
  0x19   : > { %p644_p2 = pneg %p643_p1 }
  0x1b   : > { %p649_p4 = pnand %p647_p3, %p644_p2 }
  0x1d   : > { %652 = shalt.err (!%p649_p4)
}
  0x1e   : > { %s653_s16 = scalar_lea.vmem %s173_s7, 256  ;;  %p661_p9 = scmp.lt.s32.totalorder %s173_s7, %s173_s7 }
  0x1f   : > { %p654_p7 = scmp.ne.s32.totalorder %s173_s7, %s653_s16  ;;  %p662_p6 = scmp.lt.s32.totalorder %s653_s16, %s653_s16 }
  0x21   : > { %p656_p8 = pnand %p654_p7, %p642_p0  ;;  %p663_p5 = por %p662_p6, %p661_p9 }
  0x23   : > { %p657_p11 = pneg %p656_p8 }
  0x25   : > { %p664_p10 = pnand %p663_p5, %p657_p11 }
  0x27   : > { %667 = shalt.err (!%p664_p10)
}
  0x28   : > { %s737_s17 = smov 128   ;;  %s738_s23 = smov 8  }
  0x29   : > { %588 = dma.hbm_to_vmem [thread:$0]  (!%p834_p12), %s927_s1, 256, %s173_s7, [#allocation3], %s737_s17, %s737_s17, %s738_s23  }
  0x2a   : > { %p939_p13 = scmp.ne.s32.totalorder %s937_s30, 0 }
  0x2b   : > { %p940_p1 = scmp.eq.s32.totalorder (!%p939_p13), %s798_s22, 0 }
  0x2c   : > { %204 = sbr.rel (%p939_p13) target bundleno = 642 (0x282), region = 40 }
  0x33   : > { %713 = dma.done.wait (%p940_p1), [#allocation3], 256   ;;  %p941_p0 = pmov %p940_p1 }
  0x34   : > { %p231_p5 = scmp.lt.s32.totalorder %s798_s22, 1  ;;  %v739_v0 = vmov 0   ;;  %vm272_vm0 = vcmask 195584   ;;  %v258_v2 = vld [vmem:[#allocation2] sm:$0xff]  ;;  %s740_s30 = smov 1   ;;  %v261_v4 = vld [vmem:[%s928_s2 + $0x8] sm:$0xff]  ;;  %v236_v5 = vlaneseq }
  0x35   : > { %715 = vsyncadd (%p941_p0), [#allocation3], 4294967040  ;;  %638 = vset.pattern.permute.xlu1 %v739_v0  ;;  %639 = vset.pattern.permute.xlu0 %v739_v0  ;;  %v260_v3 = vld [vmem:[%s928_s2] sm:$0xff]  ;;  %s741_s15 = smov 127   ;;  %vm742_vm2 = vmmov 1   ;;  %v259_v10 = vld [vmem:[#allocation2 + $0x8] sm:$0xff] }
  0x36   : > { %s232_s6 = scalar_select %p231_p5, %s798_s22, 1  ;;  %560 = vmatprep.mubr.msk.f32.mxu0 %vm272_vm0, %v258_v2  ;;  %264 = vperm.xlu1 %638, %v260_v3   ;;  %v237_v6 = vand.u32 127, %v236_v5  ;;  %v743_v11 = vmov 0.0|0.0   ;;  %vm744_vm5 = vmmov 0   ;;  %v745_v12 = vmov 0.0   ;;  %v359_v13 = vld [vmem:[%s930_s4] sm:$0xff] }
  0x37   : > { %576 = vmatprep.subr.bf16.mxu1 %v743_v11  ;;  %567 = vmatprep.mubr.msk.f32.mxu1 %vm744_vm5, %v745_v12  ;;  %v358_v25 = vld [vmem:[%s929_s3] sm:$0xff]  ;;  %vm365_vm6 = vcmask 130048   ;;  %s228_s26 = sand.u32 1, %s726_s19   ;;  %p942_p9 = scmp.ne.s32.totalorder %s935_s28, 0 }
  0x38   : > { %s536_s9 = sshll.u32 %s232_s6, 3  ;;  %vm250_vm1 = vcmp.ge.s32.totalorder %v237_v6, 1  ;;  %vm251_vm4 = vcmp.lt.s32.totalorder %v237_v6, 127  ;;  %s535_s6 = sshll.u32 %s228_s26, 3 }
  0x39   : > { %s234_s7 = scalar_lea.vmem %s926_s0, %s536_s9  ;;  %vm571_vm3 = vmpackc.low %vm742_vm2, %vm250_vm1  ;;  %s543_s9 = sshll.u32 %s798_s22, 7 }
  0x3a   : > { %v235_v1 = vld [vmem:[%s234_s7] sm:$0xff]  ;;  %269 = vperm.xlu1 %638, %v261_v4   ;;  %s230_s8 = scalar_lea.vmem [#allocation5], %s535_s6  ;;  %s884_s11 = scalar_lea.hbm %s931_s5, %s543_s9 }
  0x3b   : > { %252 = vrot.lane.b32.xlu0 %v235_v1, %s740_s30  ;;  %s458_s10 = sshll.u32 %s230_s8, 4  ;;  %s445_s12 = scalar_lea.sflag [#allocation4], %s228_s26  ;;  %s886_s10 = int_to_ptr.vmem [resolvable:$true] %s458_s10 }
  0x3c   : > { %s668_s13 = scalar_lea.vmem %s886_s10, 128  ;;  %s746_s22 = smov [#allocation5]  }
  0x3d   : > { %p669_p6 = scmp.ne.s32.totalorder %s886_s10, %s668_s13  ;;  %s672_s14 = sshll.u32 %s746_s22, 4  ;;  %s673_s14 = int_to_ptr.vmem [resolvable:$false] %s672_s14 }
  0x3e   : > { %p675_p2 = scmp.lt.s32.totalorder %s886_s10, %s673_s14 }
  0x3f   : > { %255 = vrot.lane.b32.xlu0 %v235_v1, %s741_s15  ;;  %p670_p10 = pnand %p669_p6, %p942_p9  ;;  %s674_s15 = scalar_lea.vmem %s673_s14, 256 }
  0x40   : > { %p676_p3 = scmp.lt.s32.totalorder %s674_s15, %s668_s13 }
  0x41   : > { %p671_p12 = pneg %p670_p10 }
  0x42   : > { %p677_p4 = por %p676_p3, %p675_p2 }
  0x43   : > { %362 = vperm.xlu0 %639, %v359_v13  }
  0x44   : > { %p678_p7 = pnand %p677_p4, %p671_p12 }
  0xad   : > { %v253_v7 = vpop.permute.xlu0 %252 }
  0xae   : > { %v570_v8 = vpack.c.bf16 %v235_v1, %v253_v7 }
  0xb0   : > { %572 = vmatprep.subr.msk.bf16.mxu0 %vm571_vm3, %v570_v8 }
  0xb1   : > { %575 = vmatpush3.bf16.msk.msra.mxu0 %vm571_vm3, %v570_v8  ;;  %v256_v9 = vpop.permute.xlu0 %255 }
  0xb2   : > { %558 = vmatprep.subr.msk.mxu0 %vm251_vm4, %v256_v9 }
  0xb5   : > { %559 = vmatpush3.msk.msra.mxu0 %vm251_vm4, %v256_v9  ;;  %v265_v14 = vpop.permute.xlu1 %264 }
  0xb6   : > { %561 = vmatmul.mubr.msk.f32.vlgmr.msra.gmra.mrb[0].mxu0 %vm272_vm0, %v259_v10 }
  0xb9   : > { %v270_v15 = vpop.permute.xlu1 %269 }
  0xc2   : > { %v363_v26 = vpop.permute.xlu0 %362 }
 0x189   : > { %v562_v16 = vpop.f32.mrb[0].mxu0 }
 0x18a   : > { %v351_v17 = vadd.f32 %v562_v16, %v270_v15  ;;  %v345_v18 = vpop.f32.mrb[1].mxu0 }
 0x18b   : > { %v346_v19 = vadd.f32 %v345_v18, %v265_v14 }
 0x18c   : > { %v355_v20 = vmul.f32 0.2, %v351_v17 }
 0x18d   : > { %v354_v21 = vmul.f32 0.2, %v346_v19 }
 0x18e   : > { %v357_v22 = vmax.f32 %v351_v17, %v355_v20 }
 0x18f   : > { %v356_v23 = vmax.f32 %v346_v19, %v354_v21 }
 0x191   : > { %v577_v24 = vpack.c.bf16 %v357_v22, %v356_v23 }
 0x193   : > { %578 = vmatpush3.bf16.msra.mxu1 %v577_v24 }
 0x196   : > { %568 = vmatmul.mubr.msk.f32.vlgmr.msra.gmra.mrb[0].mxu1 %vm365_vm6, %v358_v25 }
 0x269   : > { %v435_v27 = vpop.f32.mrb[0].mxu1 }
 0x26a   : > { %v436_v28 = vadd.f32 %v435_v27, %v363_v26  ;;  %v569_v29 = vpop.f32.mrb[1].mxu1 }
 0x26c   : > { %v439_v30 = vmul.f32 0.2, %v436_v28 }
 0x26e   : > { %v440_v31 = vmax.f32 %v436_v28, %v439_v30 }
 0x270   : > { %v441_v32 = vmul.f32 0.70710677, %v440_v31 }
 0x272   : > { %v442_v33 = vadd.f32 %v441_v32, %v235_v1 }
 0x274   : > { %443 = vst [vmem:[%s230_s8] sm:$0xff] %v442_v33 }
 0x275   : > { %681 = shalt.err (!%p678_p7)
}
 0x276   : > { %s682_s16 = scalar_lea.hbm %s884_s11, 128  ;;  %s686_s25 = scalar_lea.hbm %s931_s5, 256 }
 0x277   : > { %p683_p8 = scmp.ne.s32.totalorder %s884_s11, %s682_s16  ;;  %p687_p1 = scmp.lt.u32.totalorder %s884_s11, %s931_s5 }
 0x278   : > { %p688_p0 = scmp.lt.u32.totalorder %s686_s25, %s682_s16  ;;  %p690_p6 = scmp.lt.u32.totalorder %s682_s16, %s884_s11 }
 0x279   : > { %p684_p11 = pnand %p683_p8, %p942_p9 }
 0x27a   : > { %p689_p5 = por %p688_p0, %p687_p1 }
 0x27b   : > { %p685_p13 = pneg %p684_p11 }
 0x27c   : > { %p691_p10 = por %p690_p6, %p689_p5 }
 0x27e   : > { %p692_p12 = pnand %p691_p10, %p685_p13 }
 0x280   : > { %695 = shalt.err (!%p692_p12)
}
 0x281   : > { %583 = dma.vmem_to_hbm [thread:$0]  (%p942_p9), %s886_s10, 128, %s884_s11, %s445_s12  }
 0x282 PF: > { %p595_p2 = scmp.ge.s32.totalorder %s734_s21, 2  ;;  %s470_s9 = sand.u32 1, %s722_s18  }
 0x283   : > { %p943_p3 = scmp.ne.s32.totalorder %s936_s29, 0  ;;  %s471_s8 = scalar_lea.sflag [#allocation4], %s470_s9 }
 0x285   : > { %p590_p4 = pnand %p595_p2, %p943_p3 }
 0x287   : > { %717 = dma.done.wait (!%p590_p4), %s471_s8, 128  }
 0x288   : > { %719 = vsyncadd (!%p590_p4), %s471_s8, 4294967168  ;;  %p16_p7 = scmp.ge.s32.totalorder %s802_s24, 4   ;;  %s944_s18 = smov %s726_s19 }
 0x289   : > { %s945_s19 = smov %s730_s20  ;;  %s946_s20 = smov %s813_s27 }
 0x28a   : > { %s947_s21 = smov %s802_s24  ;;  %18 = sbr.rel (!%p16_p7) target bundleno = 4 (0x4), region = 80 }
 0x291   :  { %476 = vsyncpa [#allocation3], 1 }
 0x292   :  { %478 = vsyncpa [#allocation3 + $0x1], 1 }
 0x293   :  { %479 = vsyncpa [#allocation4], 1 }
 0x294   :  { %481 = vsyncpa [#allocation4 + $0x1], 1 }

</bundles_post_ra>
